<compile_context>
chip_gen: v7x
topology: tpu7x:2x2x1
jax: 0.10.0
libtpu: 0.0.40
codegen_flags: <defaults>
</compile_context>

<pallas_src>
import jax
import jax.numpy as jnp
from jax.experimental import pallas as pl
from jax.experimental.pallas import tpu as pltpu


# ----------------------------------------------------------------------------
# Small helpers
# ----------------------------------------------------------------------------
def _round_up(v: int, m: int) -> int:
    return -(-v // m) * m


def _cdiv(a: int, b: int) -> int:
    return -(-a // b)


def _crop_offsets(h: int, w: int, th: int, tw: int):
    # The PyTorch reference itself uses Python's round() (banker's rounding on
    # exact .5), so using the identical expression guarantees identical
    # offsets for every (h-th)/(w-tw) parity.
    x1 = int(round((w - tw) / 2.0))
    y1 = int(round((h - th) / 2.0))
    return y1, x1


def _sublane_multiple(dtype) -> int:
    # Dtype-aware sublane packing for the VMEM footprint estimate.
    return {4: 8, 2: 16, 1: 32}.get(jnp.dtype(dtype).itemsize, 8)


def _vmem_capacity_bytes() -> int:
    try:
        return int(pltpu.get_tpu_info().vmem_capacity_bytes)
    except Exception:
        return 64 * 1024 * 1024   # safe lower bound across v5e/v6e/v7x


def _split_sizes(total: int, parts: int):
    """Split `total` into <=parts nearly-equal positive static sizes."""
    parts = max(1, min(parts, total))
    q, r = divmod(total, parts)
    return [q + (1 if j < r else 0) for j in range(parts)]


# ----------------------------------------------------------------------------
# dimension_semantics chooser: try CORE_PARALLEL (v7x: both TCs issue DMAs),
# fall back to ARBITRARY if the platform rejects it.  Choice is cached.
# ----------------------------------------------------------------------------
_CHOSEN_SEMANTICS = {}


def _run_with_semantics_fallback(cache_key, build, *args):
    cached = _CHOSEN_SEMANTICS.get(cache_key)
    if cached is not None:
        candidates = (cached,)
    else:
        candidates = ((pltpu.CORE_PARALLEL,), (pltpu.ARBITRARY,))
    err = None
    for sem in candidates:
        try:
            out = jax.block_until_ready(build(sem)(*args))
            _CHOSEN_SEMANTICS[cache_key] = sem
            return out
        except Exception as e:       # lowering/compile rejection -> fall back
            err = e
    raise err


# ----------------------------------------------------------------------------
# Path A: direct HBM -> HBM strided DMA (no VMEM, no TensorCore work).
# ----------------------------------------------------------------------------
def _crop_dma_hbm_to_hbm(x_planes, th, tw, y1, x1):
    num_planes, h, w = x_planes.shape
    dtype = x_planes.dtype
    itemsize = jnp.dtype(dtype).itemsize

    # Two grid steps -> a clean 2-way split under CORE_PARALLEL on v7x; on
    # 1-TC chips the extra step only costs one DMA-completion gap.
    num_steps = 2 if num_planes >= 2 else 1
    planes_per_step = _cdiv(num_planes, num_steps)

    # 2-4 concurrent sub-copies hide HBM latency; use more when the contiguous
    # runs (tw*itemsize) are short and a single queue cannot saturate the bus.
    want_copies = 8 if tw * itemsize < 512 else 4
    sizes = _split_sizes(planes_per_step, want_copies)
    offs, acc = [], 0
    for s in sizes:
        offs.append(acc)
        acc += s
    k_copies = len(sizes)

    def kernel(x_hbm, o_hbm, sems):
        base = pl.program_id(0) * planes_per_step
        copies = []
        for j in range(k_copies):
            sz = sizes[j]
            # Clamp the start so the last step's windows never run OOB; the
            # (at most one plane of) overlap rewrites identical data, which is
            # harmless for a pure copy.
            start = jnp.minimum(base + offs[j], num_planes - sz)
            src = x_hbm.at[pl.ds(start, sz), pl.ds(y1, th), pl.ds(x1, tw)]
            dst = o_hbm.at[pl.ds(start, sz), pl.ds(0, th), pl.ds(0, tw)]
            cp = pltpu.make_async_copy(src, dst, sems.at[j])
            cp.start()
            copies.append(cp)
        for cp in copies:            # all k copies stay in flight together
            cp.wait()

    def build(semantics):
        return pl.pallas_call(
            kernel,
            out_shape=jax.ShapeDtypeStruct((num_planes, th, tw), dtype),
            grid=(num_steps,),
            in_specs=[pl.BlockSpec(memory_space=pl.ANY)],   # raw HBM, no auto-DMA
            out_specs=pl.BlockSpec(memory_space=pl.ANY),    # written by DMA only
            scratch_shapes=[pltpu.SemaphoreType.DMA((k_copies,))],
            compiler_params=pltpu.CompilerParams(
                dimension_semantics=semantics),
        )

    return _run_with_semantics_fallback("dma", build, x_planes)


# ----------------------------------------------------------------------------
# Path B: full-width row reads + on-chip width crop (small-tw regime).
# ----------------------------------------------------------------------------
def _crop_rowread_vmem(x_planes, th, tw, y1, x1, block_planes=None):
    num_planes, h, w = x_planes.shape
    dtype = x_planes.dtype
    itemsize = jnp.dtype(dtype).itemsize
    sub = _sublane_multiple(dtype)

    capacity = _vmem_capacity_bytes()
    budget = (capacity * 3) // 8            # ~48 MiB on v5e/v6e, ~24 MiB on v7x
    buf_plane = _round_up(th, sub) * _round_up(w, 128) * itemsize
    out_plane = _round_up(th, sub) * _round_up(tw, 128) * itemsize
    per_plane = buf_plane + 2 * out_plane   # row scratch + double-buffered out

    if per_plane > budget:
        return None                         # a single plane doesn't fit: use "dma"

    bp = max(1, min(num_planes, budget // per_plane))
    # Prefer >= 4 grid steps so the output writeback of block i overlaps the
    # row read of block i+1; per-step overhead (~0.35us) is negligible at
    # MB-sized blocks, so this costs nothing for large inputs.
    bp = min(bp, max(1, _cdiv(num_planes, 4)))
    if block_planes is not None:            # testing / tuning override
        bp = max(1, min(num_planes, int(block_planes)))

    nsteps = _cdiv(num_planes, bp)
    tail = num_planes - (nsteps - 1) * bp   # static size of the ragged block

    vmem_needed = bp * per_plane
    vmem_limit = min(capacity, max(vmem_needed + (8 << 20), 32 << 20))

    def kernel(x_hbm, o_ref, rows, sem):
        i = pl.program_id(0)

        def fetch(nplanes):
            # Rows y1..y1+th of each plane are contiguous, so this DMA moves
            # long th*w*itemsize runs at full HBM bandwidth.
            src = x_hbm.at[pl.ds(i * bp, nplanes), pl.ds(y1, th), pl.ds(0, w)]
            cp = pltpu.make_async_copy(src, rows.at[pl.ds(0, nplanes)], sem)
            cp.start()
            cp.wait()

        if tail == bp:                       # block evenly divides the planes
            fetch(bp)
        else:                                # statically-sized ragged tail
            @pl.when(i < nsteps - 1)
            def _():
                fetch(bp)

            @pl.when(i == nsteps - 1)
            def _():
                fetch(tail)

        # Width crop on-chip.  Planes >= tail of the last block hold stale
        # scratch data, but the output pipeline clips the write to bounds.
        o_ref[...] = rows[:, :, pl.ds(x1, tw)]

    def build(semantics):
        return pl.pallas_call(
            kernel,
            out_shape=jax.ShapeDtypeStruct((num_planes, th, tw), dtype),
            grid=(nsteps,),
            in_specs=[pl.BlockSpec(memory_space=pl.ANY)],
            out_specs=pl.BlockSpec((bp, th, tw), lambda i: (i, 0, 0)),
            scratch_shapes=[pltpu.VMEM((bp, th, w), dtype),
                            pltpu.SemaphoreType.DMA],
            compiler_params=pltpu.CompilerParams(
                dimension_semantics=semantics,
                vmem_limit_bytes=vmem_limit),
        )

    return _run_with_semantics_fallback("rowread", build, x_planes)


# ----------------------------------------------------------------------------
# Public wrapper
# ----------------------------------------------------------------------------
def crop2d_center_pallas(x, th: int, tw: int, *, mode: str = "auto",
                         block_planes=None):
    """Center-crop an NCHW (or CHW) tensor to (th, tw) spatial size."""
    assert x.ndim in (3, 4)
    assert x.shape[-1] >= tw
    assert x.shape[-2] >= th

    h, w = x.shape[-2], x.shape[-1]
    y1, x1 = _crop_offsets(h, w, th, tw)

    if th == h and tw == w:                  # nothing to crop
        return x

    lead = x.shape[:-2]                      # (N, C) or (C,)
    num_planes = 1
    for d in lead:
        num_planes *= d
    # NOTE: free only for a contiguous NCHW layout; a non-default layout from
    # an upstream op would force XLA to materialize a copy here (perf only).
    x_planes = x.reshape(num_planes, h, w)

    itemsize = jnp.dtype(x.dtype).itemsize
    if mode == "auto":
        run_bytes = tw * itemsize
        # Short contiguous runs read far below HBM peak -> prefer full-row
        # reads + on-chip width crop, unless that would over-read by more than
        # ~8x (the approximate penalty of short strided runs).
        if run_bytes >= 512 or w > 8 * tw:
            mode = "dma"
        else:
            mode = "rowread"

    out = None
    if mode == "rowread":
        out = _crop_rowread_vmem(x_planes, th, tw, y1, x1, block_planes)
    if out is None:                          # "dma" requested, or rowread too big
        out = _crop_dma_hbm_to_hbm(x_planes, th, tw, y1, x1)

    return out.reshape(*lead, th, tw)


class Crop2d:
    """JAX/Pallas port of kompil.nn.layers.crop.Crop2d (no parameters)."""

    def __init__(self, th: int, tw: int):
        self._th = int(th)
        self._tw = int(tw)

    def __call__(self, x):
        return crop2d_center_pallas(x, self._th, self._tw)

    def extra_repr(self) -> str:
        return f"th={self._th}, tw={self._tw}"


if __name__ == "__main__":
    key = jax.random.PRNGKey(0)
    # NCHW input: batch=2, channels=4, spatial=16x16.
    x = jax.random.normal(key, (2, 4, 16, 16), dtype=jnp.float32)

    th, tw = 8, 10
    y1, x1 = _crop_offsets(16, 16, th, tw)
    ref = x[:, :, y1:y1 + th, x1:x1 + tw]

    crop = Crop2d(th, tw)

    # 1) auto mode (small tw -> "rowread" full-row-read path).
    out_auto = jax.block_until_ready(crop(x))
    assert out_auto.shape == (2, 4, th, tw), out_auto.shape
    assert out_auto.dtype == x.dtype
    assert jnp.array_equal(out_auto, ref), "mismatch (auto/rowread, NCHW)"

    # 2) forced direct HBM->HBM strided-DMA path.
    out_dma = jax.block_until_ready(crop2d_center_pallas(x, th, tw, mode="dma"))
    assert jnp.array_equal(out_dma, ref), "mismatch (dma path)"

    # 3) rowread path with a block size that does NOT divide N*C=8, to
    #    exercise the statically-sized ragged tail handling.
    out_tail = jax.block_until_ready(
        crop2d_center_pallas(x, th, tw, mode="rowread", block_planes=3))
    assert jnp.array_equal(out_tail, ref), "mismatch (rowread ragged tail)"

    # 4) 3-D (CHW) path of the original module.
    x3 = x[0]
    out3 = jax.block_until_ready(crop(x3))
    assert out3.shape == (4, th, tw), out3.shape
    assert jnp.array_equal(out3, x3[:, y1:y1 + th, x1:x1 + tw]), "mismatch (CHW)"

    print("KERNEL_OK")
</pallas_src>

<mosaic_0001>
module attributes {stable_mosaic.version = 11 : i64} {
  func.func @kernel(%arg0: i32, %arg1: memref<8x16x16xf32, #tpu.memory_space<any>>, %arg2: memref<2x8x10xf32, #tpu.memory_space<vmem>>, %arg3: memref<2x8x16xf32, #tpu.memory_space<vmem>>, %arg4: memref<!tpu.dma_semaphore, #tpu.memory_space<semaphore_mem>>) attributes {dimension_semantics = [#tpu.dimension_semantics<core_parallel>], iteration_bounds = array<i64: 4>, scalar_prefetch = 0 : i64, scratch_operands = 2 : i64, tpu.core_type = #tpu.core_type<tc>, window_params = [{}, {transform_indices = @transform_1, window_bounds = array<i64: 2, 8, 10>}]} {
    %c2_i32 = arith.constant 2 : i32
    %0 = arith.muli %arg0, %c2_i32 : i32
    %c4_i32 = arith.constant 4 : i32
    %c0_i32 = arith.constant 0 : i32
    %1 = tpu.memref_slice %arg1[%0, %c4_i32, %c0_i32] : memref<8x16x16xf32, #tpu.memory_space<any>> -> memref<2x8x16xf32, #tpu.memory_space<any>>
    %c0_i32_0 = arith.constant 0 : i32
    %c0_i32_1 = arith.constant 0 : i32
    %c0_i32_2 = arith.constant 0 : i32
    %2 = tpu.memref_slice %arg3[%c0_i32_0, %c0_i32_1, %c0_i32_2] : memref<2x8x16xf32, #tpu.memory_space<vmem>> -> memref<2x8x16xf32, #tpu.memory_space<vmem>>
    tpu.enqueue_dma source(%1 : memref<2x8x16xf32, #tpu.memory_space<any>>) target(%2 : memref<2x8x16xf32, #tpu.memory_space<vmem>>) target_semaphore(%arg4 : memref<!tpu.dma_semaphore, #tpu.memory_space<semaphore_mem>>)
    %c4_i32_3 = arith.constant 4 : i32
    %c0_i32_4 = arith.constant 0 : i32
    %3 = tpu.memref_slice %arg1[%0, %c4_i32_3, %c0_i32_4] : memref<8x16x16xf32, #tpu.memory_space<any>> -> memref<2x8x16xf32, #tpu.memory_space<any>>
    %c0_i32_5 = arith.constant 0 : i32
    %c0_i32_6 = arith.constant 0 : i32
    %c0_i32_7 = arith.constant 0 : i32
    %4 = tpu.memref_slice %arg3[%c0_i32_5, %c0_i32_6, %c0_i32_7] : memref<2x8x16xf32, #tpu.memory_space<vmem>> -> memref<2x8x16xf32, #tpu.memory_space<vmem>>
    tpu.wait_dma2 semaphore(%arg4 : memref<!tpu.dma_semaphore, #tpu.memory_space<semaphore_mem>>) src(%3 : memref<2x8x16xf32, #tpu.memory_space<any>>) dst(%4 : memref<2x8x16xf32, #tpu.memory_space<vmem>>)
    %c0 = arith.constant 0 : index
    %c0_8 = arith.constant 0 : index
    %c3 = arith.constant 3 : index
    %5 = vector.load %arg3[%c0, %c0_8, %c3] : memref<2x8x16xf32, #tpu.memory_space<vmem>>, vector<2x8x10xf32>
    %c0_9 = arith.constant 0 : index
    %c0_10 = arith.constant 0 : index
    %c0_11 = arith.constant 0 : index
    %6 = vector.load %arg2[%c0_9, %c0_10, %c0_11] : memref<2x8x10xf32, #tpu.memory_space<vmem>>, vector<2x8x10xf32>
    tpu.vector_store %arg2[%c0_9, %c0_10, %c0_11], %5 {strides = array<i32>} : memref<2x8x10xf32, #tpu.memory_space<vmem>>, vector<2x8x10xf32>,
    return
  }
  func.func @transform_1(%arg0: i32) -> (i32, i32, i32) {
    %c0_i32 = arith.constant 0 : i32
    %c0_i32_0 = arith.constant 0 : i32
    %c0_i32_1 = arith.constant 0 : i32
    return %arg0, %c0_i32, %c0_i32_0 : i32, i32, i32
  }
}

module attributes {stable_mosaic.version = 11 : i64} {
  func.func @kernel(%arg0: i32, %arg1: memref<8x16x16xf32, #tpu.memory_space<any>>, %arg2: memref<2x8x10xf32, #tpu.memory_space<vmem>>, %arg3: memref<2x8x16xf32, #tpu.memory_space<vmem>>, %arg4: memref<!tpu.dma_semaphore, #tpu.memory_space<semaphore_mem>>) attributes {dimension_semantics = [#tpu.dimension_semantics<arbitrary>], iteration_bounds = array<i64: 4>, scalar_prefetch = 0 : i64, scratch_operands = 2 : i64, tpu.core_type = #tpu.core_type<tc>, window_params = [{}, {transform_indices = @transform_1, window_bounds = array<i64: 2, 8, 10>}]} {
    %c2_i32 = arith.constant 2 : i32
    %0 = arith.muli %arg0, %c2_i32 : i32
    %c4_i32 = arith.constant 4 : i32
    %c0_i32 = arith.constant 0 : i32
    %1 = tpu.memref_slice %arg1[%0, %c4_i32, %c0_i32] : memref<8x16x16xf32, #tpu.memory_space<any>> -> memref<2x8x16xf32, #tpu.memory_space<any>>
    %c0_i32_0 = arith.constant 0 : i32
    %c0_i32_1 = arith.constant 0 : i32
    %c0_i32_2 = arith.constant 0 : i32
    %2 = tpu.memref_slice %arg3[%c0_i32_0, %c0_i32_1, %c0_i32_2] : memref<2x8x16xf32, #tpu.memory_space<vmem>> -> memref<2x8x16xf32, #tpu.memory_space<vmem>>
    tpu.enqueue_dma source(%1 : memref<2x8x16xf32, #tpu.memory_space<any>>) target(%2 : memref<2x8x16xf32, #tpu.memory_space<vmem>>) target_semaphore(%arg4 : memref<!tpu.dma_semaphore, #tpu.memory_space<semaphore_mem>>)
    %c4_i32_3 = arith.constant 4 : i32
    %c0_i32_4 = arith.constant 0 : i32
    %3 = tpu.memref_slice %arg1[%0, %c4_i32_3, %c0_i32_4] : memref<8x16x16xf32, #tpu.memory_space<any>> -> memref<2x8x16xf32, #tpu.memory_space<any>>
    %c0_i32_5 = arith.constant 0 : i32
    %c0_i32_6 = arith.constant 0 : i32
    %c0_i32_7 = arith.constant 0 : i32
    %4 = tpu.memref_slice %arg3[%c0_i32_5, %c0_i32_6, %c0_i32_7] : memref<2x8x16xf32, #tpu.memory_space<vmem>> -> memref<2x8x16xf32, #tpu.memory_space<vmem>>
    tpu.wait_dma2 semaphore(%arg4 : memref<!tpu.dma_semaphore, #tpu.memory_space<semaphore_mem>>) src(%3 : memref<2x8x16xf32, #tpu.memory_space<any>>) dst(%4 : memref<2x8x16xf32, #tpu.memory_space<vmem>>)
    %c0 = arith.constant 0 : index
    %c0_8 = arith.constant 0 : index
    %c3 = arith.constant 3 : index
    %5 = vector.load %arg3[%c0, %c0_8, %c3] : memref<2x8x16xf32, #tpu.memory_space<vmem>>, vector<2x8x10xf32>
    %c0_9 = arith.constant 0 : index
    %c0_10 = arith.constant 0 : index
    %c0_11 = arith.constant 0 : index
    %6 = vector.load %arg2[%c0_9, %c0_10, %c0_11] : memref<2x8x10xf32, #tpu.memory_space<vmem>>, vector<2x8x10xf32>
    tpu.vector_store %arg2[%c0_9, %c0_10, %c0_11], %5 {strides = array<i32>} : memref<2x8x10xf32, #tpu.memory_space<vmem>>, vector<2x8x10xf32>,
    return
  }
  func.func @transform_1(%arg0: i32) -> (i32, i32, i32) {
    %c0_i32 = arith.constant 0 : i32
    %c0_i32_0 = arith.constant 0 : i32
    %c0_i32_1 = arith.constant 0 : i32
    return %arg0, %c0_i32, %c0_i32_0 : i32, i32, i32
  }
}

</mosaic_0001>

<bundles_post_ra>
// kernel: tpu_custom_call.1
= control target key start
LH: loop header
LB: loop body
LE: loop exit
PB: predicated region body
PF: predicated region fallthrough
CT: control target
= control target key end

     0   :  { %6 = vsyncpa [#allocation5], 0  ;;  %s400_s0 = inlined_call_operand.hbm [shape: f32[8,16,16], index: 0, kind: input, shape index: {}]   ;;  %s401_s1 = inlined_call_operand.hbm [shape: f32[8,8,10], index: 1, kind: output, shape index: {}]  }
   0x1   :  { %8 = vsyncpa [#allocation5 + $0x1], 0  ;;  %s294_s6 = smov 0   ;;  %s296_s7 = smov 0  }
   0x2   :  { %s298_s8 = smov 0  }
   0x3 LB: > { %s145_s9 = sadd.s32 4294967295, %s276_s8   ;;  %s311_s10 = sadd.s32 1, %s276_s8   ;;  %s276_s8 = sphi %s298_s8, %s406_s8   ;;  %s272_s7 = sphi %s296_s7, %s405_s7   ;;  %s268_s6 = sphi %s294_s6, %s404_s6  }
   0x4   : > { %s17_s11 = ssub.s32 %s276_s8, %s311_s10  ;;  %s20_s12 = sadd.s32 1, %s272_s7 }
   0x5   : > { %p18_p0 = scmp.eq.s32.totalorder %s17_s11, 0  ;;  %p146_p1 = scmp.ne.s32.totalorder %s17_s11, 0 }
   0x6   : > { %p24_p2 = scmp.eq.s32.totalorder %s276_s8, 3  ;;  %p29_p3 = scmp.ne.s32.totalorder %s272_s7, %s268_s6 }
   0x7   : > { %s320_s13 = scalar_select %p18_p0, %s272_s7, %s20_s12  }
   0x8   : > { %p322_p4 = por %p146_p1, %p24_p2  ;;  %p30_p5 = scmp.eq.s32.totalorder %s145_s9, 3 }
   0x9   : > { %p147_p7 = scmp.ge.s32.totalorder %s276_s8, 4 }
   0xa   : > { %p326_p6 = por %p30_p5, %p29_p3  ;;  %s44_s16 = sand.u32 (!%p147_p7), 1, %s272_s7  }
   0xb   : > { %39 = sbr.rel (%p147_p7) target bundleno = 171 (0xab), region = 12  ;;  %s157_s17 = sshll.u32 (!%p147_p7), %s276_s8, 9 }
   0xc   : > { %s335_s18 = sshll.u32 (!%p147_p7), %s44_s16, 4  ;;  %s124_s21 = scalar_lea.hbm (!%p147_p7), %s400_s0, %s157_s17 }
   0xd   : > { %s125_s22 = scalar_lea.hbm (!%p147_p7), %s124_s21, 64  ;;  %s278_s23 = smov (!%p147_p7), [#allocation2]  }
   0xe   : > { %s54_s24 = sshll.u32 (!%p147_p7), %s278_s23, 4  ;;  %s219_s25 = scalar_lea.hbm (!%p147_p7), %s124_s21, 320  ;;  %s55_s24 = int_to_ptr.vmem [resolvable:$true] %s54_s24 }
   0xf   : > { %p196_p8 = scmp.ne.s32.totalorder (!%p147_p7), %s125_s22, %s219_s25  ;;  %s197_s28 = scalar_lea.hbm (!%p147_p7), %s400_s0, 2048 }
  0x10   : > { %p198_p9 = scmp.lt.u32.totalorder (!%p147_p7), %s125_s22, %s400_s0  ;;  %p199_p10 = scmp.lt.u32.totalorder (!%p147_p7), %s197_s28, %s219_s25 }
  0x11   : > { %p201_p12 = scmp.lt.u32.totalorder (!%p147_p7), %s219_s25, %s125_s22 }
  0x12   : > { %p200_p11 = por %p199_p10, %p198_p9 }
  0x14   : > { %p202_p13 = por %p201_p12, %p200_p11 }
  0x16   : > { %p203_p0 = pnand %p202_p13, %p196_p8 }
  0x18   : > { %206 = shalt.err (!%p203_p0)  }
  0x19   : > { %s207_s2 = scalar_lea.vmem %s55_s24, 256  ;;  %p212_p2 = scmp.lt.s32.totalorder %s55_s24, %s55_s24 }
  0x1a   : > { %p208_p1 = scmp.ne.s32.totalorder %s55_s24, %s207_s2  ;;  %p213_p3 = scmp.lt.s32.totalorder %s207_s2, %s207_s2 }
  0x1c   : > { %p214_p5 = por %p213_p3, %p212_p2 }
  0x1e   : > { %p215_p7 = pnand %p214_p5, %p208_p1 }
  0x20   : > { %218 = shalt.err (!%p215_p7)  }
  0x21   : > { %s279_s3 = smov 256   ;;  %s280_s4 = smov 128  }
  0x22   : > { %s281_s5 = smov 8   ;;  %s46_s9 = scalar_lea.vmem [#allocation4], %s335_s18 }
  0x23   : > { %57 = dma.hbm_to_vmem [thread:$0]  %s125_s22, 256, %s55_s24, [#allocation3], %s279_s3, %s280_s4, %s281_s5 }
  0x24   : > { %260 = dma.done.wait [#allocation3], 256 }
  0x25   : > { %261 = vsyncadd [#allocation3], 4294967040  ;;  %v62_v0 = vld [vmem:[#allocation2] sm:$0xff]  ;;  %s282_s11 = smov 125   ;;  %v63_v1 = vld [vmem:[#allocation2 + $0x8] sm:$0xff]  ;;  %vm72_vm0 = vcmask 80896  }
  0x26   : > { %66 = vrot.lane.b32.xlu0 %v62_v0, %s282_s11  ;;  %s158_s12 = sshll.u32 %s276_s8, 8  ;;  %s89_s17 = sshll.u32 %s46_s9, 4  ;;  %s355_s17 = int_to_ptr.vmem [resolvable:$true] %s89_s17 }
  0x27   : > { %s353_s21 = scalar_lea.hbm %s401_s1, %s158_s12  ;;  %s359_s18 = scalar_lea.sflag [#allocation5], %s44_s16 }
  0x28   : > { %s220_s22 = scalar_lea.vmem %s355_s17, 256  ;;  %s283_s23 = smov [#allocation4]  }
  0x29   : > { %p221_p8 = scmp.ne.s32.totalorder %s355_s17, %s220_s22  ;;  %s224_s24 = sshll.u32 %s283_s23, 4  ;;  %s225_s24 = int_to_ptr.vmem [resolvable:$false] %s224_s24 }
  0x2a   : > { %68 = vrot.lane.b32.xlu0 %v63_v1, %s282_s11  ;;  %s226_s25 = scalar_lea.vmem %s225_s24, 512  ;;  %p227_p11 = scmp.lt.s32.totalorder %s355_s17, %s225_s24 }
  0x2b   : > { %p222_p9 = pnand %p221_p8, %p322_p4  ;;  %p228_p12 = scmp.lt.s32.totalorder %s226_s25, %s220_s22 }
  0x2d   : > { %p223_p10 = pneg %p222_p9  ;;  %p229_p13 = por %p228_p12, %p227_p11 }
  0x2f   : > { %p230_p0 = pnand %p229_p13, %p223_p10 }
  0x98   : > { %v67_v2 = vpop.permute.xlu0 %66 }
  0x99   : > { %73 = vst.msk [vmem:[%s46_s9] sm:$0xff] %vm72_vm0, %v67_v2 }
  0x9c   : > { %v69_v3 = vpop.permute.xlu0 %68 }
  0x9d   : > { %74 = vst.msk [vmem:[%s46_s9 + $0x8] sm:$0xff] %vm72_vm0, %v69_v3 }
  0x9e   : > { %233 = shalt.err (!%p230_p0)
}
  0x9f   : > { %s234_s16 = scalar_lea.hbm %s353_s21, 256  ;;  %s238_s28 = scalar_lea.hbm %s401_s1, 1024 }
  0xa0   : > { %p235_p1 = scmp.ne.s32.totalorder %s353_s21, %s234_s16  ;;  %p239_p5 = scmp.lt.u32.totalorder %s353_s21, %s401_s1 }
  0xa1   : > { %p240_p7 = scmp.lt.u32.totalorder %s238_s28, %s234_s16  ;;  %p242_p9 = scmp.lt.u32.totalorder %s234_s16, %s353_s21 }
  0xa2   : > { %p236_p2 = pnand %p235_p1, %p322_p4 }
  0xa3   : > { %p241_p8 = por %p240_p7, %p239_p5 }
  0xa4   : > { %p237_p3 = pneg %p236_p2 }
  0xa5   : > { %p243_p10 = por %p242_p9, %p241_p8 }
  0xa7   : > { %p244_p11 = pnand %p243_p10, %p237_p3 }
  0xa9   : > { %247 = shalt.err (!%p244_p11)
}
  0xaa   : > { %159 = dma.vmem_to_hbm [thread:$0]  (%p322_p4), %s355_s17, 256, %s353_s21, %s359_s18, %s280_s4, %s280_s4, %s281_s5  }
  0xab PF: > { %p165_p12 = scmp.ge.s32.totalorder %s276_s8, 1  ;;  %s104_s2 = sand.u32 1, %s268_s6  }
  0xac   : > { %s105_s3 = scalar_lea.sflag [#allocation5], %s104_s2 }
  0xad   : > { %p162_p13 = pnand %p165_p12, %p326_p6 }
  0xaf   : > { %263 = dma.done.wait (!%p162_p13), %s105_s3, 256  }
  0xb0   : > { %265 = vsyncadd (!%p162_p13), %s105_s3, 4294967040  ;;  %p11_p0 = scmp.ge.s32.totalorder %s311_s10, 5   ;;  %s404_s6 = smov %s272_s7 }
  0xb1   : > { %s405_s7 = smov %s320_s13  ;;  %s406_s8 = smov %s311_s10 }
  0xb2   :  { %13 = sbr.rel (!%p11_p0) target bundleno = 3 (0x3), region = 45 }
  0xb9   :  { %110 = vsyncpa [#allocation5], 1 }
  0xba   :  { %112 = vsyncpa [#allocation5 + $0x1], 1 }
  0xbb   :  { %113 = vsyncmov [#allocation3] }
  0xbe   :  { %s114_s8 = vpop.sfrf %113 }
  0xbf   :  { %p156_p4 = scmp.ne.s32.totalorder %s114_s8, 0 }
  0xc1   :  { %118 = shalt.err (%p156_p4)  }

</bundles_post_ra>
